<compile_context>
chip_gen: v6e
topology: v6e:2x2x1
jax: 0.10.0
libtpu: 0.0.40
codegen_flags: <defaults>
</compile_context>

<pallas_src>
import functools

import jax
import jax.numpy as jnp
from jax.experimental import pallas as pl
from jax.experimental.pallas import tpu as pltpu


_VMEM_BUDGET = 20 * 1024 * 1024   # tile-selection budget (safe on v5e/v6e/v7x)
_VMEM_LIMIT = 32 * 1024 * 1024    # explicit scoped-VMEM request (< v7x 64 MiB phys)
_MAX_BATCH_TILE = 16              # max images per grid step (unrolled in-kernel)


def _conv1x1_mxu_kernel(t_n, x_ref, w_ref, o_ref):
    # x_ref: (t_n, Cin, t_hw)  w_ref: (t_co, Cin)  o_ref: (t_n, t_co, t_hw)
    w = w_ref[...]                               # hoisted: one load per step
    for i in range(t_n):                         # t_n <= 16, fully unrolled
        o_ref[i] = jnp.dot(
            w, x_ref[i], preferred_element_type=jnp.float32
        ).astype(o_ref.dtype)


def _conv1x1_vpu_kernel(t_n, cin, x_ref, w_ref, o_ref):
    # Tiny channel count: the MXU would be <0.1% utilized (K = Cout = 4 of 128),
    # so do the contraction on the VPU as cin broadcast-multiply-adds over the
    # lane-dense (t_co, t_hw) block.  Elementwise math stays in f32 (v5e VPU
    # has no bf16 path).
    w = w_ref[...].astype(jnp.float32)           # (cout, cin), hoisted
    for i in range(t_n):                         # t_n <= 16, fully unrolled
        x = x_ref[i].astype(jnp.float32)         # (cin, t_hw)
        acc = w[:, 0:1] * x[0:1, :]              # (cout,1)*(1,t_hw)->(cout,t_hw)
        for c in range(1, cin):                  # cin <= 8, fully unrolled
            acc = acc + w[:, c:c + 1] * x[c:c + 1, :]
        o_ref[i] = acc.astype(o_ref.dtype)


def _largest_divisor(total, align, cap):
    """Largest multiple of `align` that divides `total` and is <= cap, or None."""
    cap = min(cap, total)
    start = (cap // align) * align
    for t in range(start, 0, -align):
        if total % t == 0:
            return t
    return None


def _conv1x1_pallas(x3, w2, out_dtype):
    """x3: (N, Cin, HW) channels-second, w2: (Cout, Cin) -> (N, Cout, HW)."""
    N, Cin, HW = x3.shape
    Cout, _ = w2.shape
    itemsize = x3.dtype.itemsize
    out_itemsize = jnp.dtype(out_dtype).itemsize

    # ---- Cout tile: full if small, otherwise a multiple-of-8 divisor sized so
    # the double-buffered weight block stays within a fraction of the budget
    # (matters for large feat_dim on v7x's 64 MiB VMEM). ----
    if Cout <= 256:
        t_co = Cout
    else:
        w_budget = _VMEM_BUDGET // 4
        cap_co = max(8, w_budget // (2 * Cin * itemsize))
        t_co = _largest_divisor(Cout, 8, cap_co) or Cout

    # ---- HW (lane) tile: largest multiple-of-128 divisor that keeps the
    # double-buffered x / out blocks plus the weight block within budget;
    # target up to 2048 lanes per step to amortize per-step overhead. ----
    w_bytes = 2 * t_co * Cin * itemsize
    per_hw = 2 * (Cin * itemsize + t_co * out_itemsize)
    cap_hw = max(1, (_VMEM_BUDGET - w_bytes) // per_hw)
    cap_hw = min(cap_hw, 2048, HW)
    t_hw = _largest_divisor(HW, 128, cap_hw)
    if t_hw is None:
        # no lane-aligned divisor (e.g. HW < 128): full extent is always legal
        t_hw = HW
    steps_per_image = (Cout // t_co) * (HW // t_hw)
    # keep at least 2 grid steps so both v7x TensorCores get work
    if N * steps_per_image < 2 and t_hw % 256 == 0:
        t_hw //= 2
        steps_per_image = (Cout // t_co) * (HW // t_hw)

    # ---- batch tile: pack several images per grid step to amortize the
    # ~0.35 us/step overhead when the per-image block is small (large-C,
    # tiny-HxW feature maps), staying within the VMEM budget and keeping >= 2
    # total steps (megacore / pipeline overlap) whenever the problem allows. ----
    def _step_bytes(tn):
        return (2 * tn * t_hw * (Cin * itemsize + t_co * out_itemsize)
                + 2 * t_co * Cin * itemsize)

    t_n = 1
    for cand in range(min(N, _MAX_BATCH_TILE), 0, -1):
        if N % cand:
            continue
        if _step_bytes(cand) > _VMEM_BUDGET:
            continue
        if (cand > 1 and (N // cand) * steps_per_image < 2
                and N * steps_per_image >= 2):
            continue
        t_n = cand
        break

    grid = (N // t_n, Cout // t_co, HW // t_hw)

    small_c = Cin <= 8 and Cout <= 8
    kernel = (functools.partial(_conv1x1_vpu_kernel, t_n, Cin)
              if small_c else functools.partial(_conv1x1_mxu_kernel, t_n))

    flops = 2 * N * Cout * Cin * HW
    bytes_accessed = int(itemsize * (N * Cin * HW + Cout * Cin)
                         + out_itemsize * N * Cout * HW)

    return pl.pallas_call(
        kernel,
        out_shape=jax.ShapeDtypeStruct((N, Cout, HW), out_dtype),
        grid_spec=pltpu.PrefetchScalarGridSpec(
            num_scalar_prefetch=0,
            grid=grid,
            in_specs=[
                # x: t_n batch images, all Cin channels, a lane-dense HW slice
                pl.BlockSpec((t_n, Cin, t_hw), lambda n, o, h: (n, 0, h)),
                # weight: constant along n/h (HW is innermost, so the block is
                # not re-fetched while streaming HW slices)
                pl.BlockSpec((t_co, Cin), lambda n, o, h: (o, 0)),
            ],
            out_specs=pl.BlockSpec((t_n, t_co, t_hw), lambda n, o, h: (n, o, h)),
        ),
        compiler_params=pltpu.CompilerParams(
            dimension_semantics=("parallel", "parallel", "parallel"),
            vmem_limit_bytes=_VMEM_LIMIT,
        ),
        cost_estimate=pl.CostEstimate(
            flops=int(flops), transcendentals=0, bytes_accessed=bytes_accessed),
    )(x3, w2)


def linear_adaptor_forward(x, weight, *, use_bf16=False):
    """JAX/Pallas equivalent of linear_adaptor.forward.

    x:      (N, C) or (N, C, H, W)   (NCHW, like PyTorch)
    weight: (feat_dim, feat_dim, 1, 1)
    use_bf16: feed bf16 operands to the kernel (halves HBM traffic on v6e/v7x);
              accumulation / output stay f32.
    returns (N, feat_dim * H * W)
    """
    if x.ndim == 2:
        x = x[:, :, None, None]
    N, C, H, W = x.shape
    Cout, Cin, kh, kw = weight.shape
    assert Cin == C and kh == 1 and kw == 1
    HW = H * W

    out_dtype = x.dtype
    # pure views only (no transpose passes): NCHW -> (N, C, H*W)
    x3 = x.reshape(N, C, HW)
    w2 = weight[:, :, 0, 0]                      # (Cout, Cin)
    if use_bf16:
        x3 = x3.astype(jnp.bfloat16)
        w2 = w2.astype(jnp.bfloat16)

    y3 = _conv1x1_pallas(x3, w2, out_dtype)      # (N, Cout, H*W)
    # (N, Cout, H*W) is already PyTorch flatten(1) (o, h, w) order
    return y3.reshape(N, Cout * HW)


if __name__ == "__main__":
    key = jax.random.PRNGKey(0)
    N, C, H, W = 2, 4, 16, 16                    # feat_dim = 4
    x = jax.random.normal(key, (N, C, H, W), dtype=jnp.float32)

    # deterministic parameter init, identical to the module's __init__ (ones)
    weight = jnp.ones((C, C, 1, 1), dtype=jnp.float32)

    out = jax.block_until_ready(linear_adaptor_forward(x, weight))
    ref = jnp.einsum("nchw,oc->nohw", x, weight[:, :, 0, 0]).reshape(N, -1)
    assert out.shape == (N, C * H * W)
    assert jnp.allclose(out, ref, atol=1e-5, rtol=1e-5)

    # 2-D input branch (x.unsqueeze(-1).unsqueeze(-1))
    x2d = jax.random.normal(jax.random.PRNGKey(1), (N, C), dtype=jnp.float32)
    out2d = jax.block_until_ready(linear_adaptor_forward(x2d, weight))
    ref2d = x2d @ weight[:, :, 0, 0].T
    assert out2d.shape == (N, C)
    assert jnp.allclose(out2d, ref2d, atol=1e-5, rtol=1e-5)

    # bf16-input option (v6e/v7x bandwidth path), loose tolerance
    out_bf = jax.block_until_ready(linear_adaptor_forward(x, weight, use_bf16=True))
    assert jnp.allclose(out_bf, ref, atol=5e-2, rtol=5e-2)

    # larger feat_dim exercises the MXU path with a random weight
    C2, H2, W2 = 128, 8, 8
    xk = jax.random.normal(jax.random.PRNGKey(2), (N, C2, H2, W2), dtype=jnp.float32)
    wk = jax.random.normal(jax.random.PRNGKey(3), (C2, C2, 1, 1), dtype=jnp.float32) * 0.05
    outk = jax.block_until_ready(linear_adaptor_forward(xk, wk))
    refk = jnp.einsum("nchw,oc->nohw", xk, wk[:, :, 0, 0]).reshape(N, -1)
    assert outk.shape == (N, C2 * H2 * W2)
    assert jnp.allclose(outk, refk, atol=2e-2, rtol=2e-2)

    # batch-tiled path: several small-HW images packed per grid step
    N3, C3, H3, W3 = 8, 32, 4, 4
    xb = jax.random.normal(jax.random.PRNGKey(4), (N3, C3, H3, W3), dtype=jnp.float32)
    wb = jax.random.normal(jax.random.PRNGKey(5), (C3, C3, 1, 1), dtype=jnp.float32) * 0.1
    outb = jax.block_until_ready(linear_adaptor_forward(xb, wb))
    refb = jnp.einsum("nchw,oc->nohw", xb, wb[:, :, 0, 0]).reshape(N3, -1)
    assert outb.shape == (N3, C3 * H3 * W3)
    assert jnp.allclose(outb, refb, atol=1e-3, rtol=1e-3)

    print("KERNEL_OK")
</pallas_src>

<mosaic_0001>
module attributes {stable_mosaic.version = 11 : i64} {
  func.func @_conv1x1_vpu_kernel(%arg0: i32, %arg1: i32, %arg2: i32, %arg3: memref<1x4x256xf32, #tpu.memory_space<vmem>>, %arg4: memref<4x4xf32, #tpu.memory_space<vmem>>, %arg5: memref<1x4x256xf32, #tpu.memory_space<vmem>>) attributes {dimension_semantics = [#tpu.dimension_semantics<parallel>, #tpu.dimension_semantics<parallel>, #tpu.dimension_semantics<parallel>], iteration_bounds = array<i64: 2, 1, 1>, scalar_prefetch = 0 : i64, scratch_operands = 0 : i64, tpu.core_type = #tpu.core_type<tc>, window_params = [{transform_indices = @transform_0, window_bounds = array<i64: 1, 4, 256>}, {transform_indices = @transform_1, window_bounds = array<i64: 4, 4>}, {transform_indices = @transform_2, window_bounds = array<i64: 1, 4, 256>}]} {
    %c0 = arith.constant 0 : index
    %c0_0 = arith.constant 0 : index
    %0 = vector.load %arg4[%c0, %c0_0] : memref<4x4xf32, #tpu.memory_space<vmem>>, vector<4x4xf32>
    %c0_1 = arith.constant 0 : index
    %c0_2 = arith.constant 0 : index
    %c0_3 = arith.constant 0 : index
    %1 = vector.load %arg3[%c0_1, %c0_2, %c0_3] : memref<1x4x256xf32, #tpu.memory_space<vmem>>, vector<1x4x256xf32>
    %2 = vector.shape_cast %1 : vector<1x4x256xf32> to vector<4x256xf32>
    %3 = vector.extract_strided_slice %0 {offsets = [0, 0], sizes = [4, 1], strides = [1, 1]} : vector<4x4xf32> to vector<4x1xf32>
    %4 = vector.extract_strided_slice %2 {offsets = [0, 0], sizes = [1, 256], strides = [1, 1]} : vector<4x256xf32> to vector<1x256xf32>
    %5 = vector.broadcast %3 : vector<4x1xf32> to vector<4x256xf32>
    %6 = vector.broadcast %4 : vector<1x256xf32> to vector<4x256xf32>
    %7 = arith.mulf %5, %6 : vector<4x256xf32>
    %8 = vector.extract_strided_slice %0 {offsets = [0, 1], sizes = [4, 1], strides = [1, 1]} : vector<4x4xf32> to vector<4x1xf32>
    %9 = vector.extract_strided_slice %2 {offsets = [1, 0], sizes = [1, 256], strides = [1, 1]} : vector<4x256xf32> to vector<1x256xf32>
    %10 = vector.broadcast %8 : vector<4x1xf32> to vector<4x256xf32>
    %11 = vector.broadcast %9 : vector<1x256xf32> to vector<4x256xf32>
    %12 = arith.mulf %10, %11 : vector<4x256xf32>
    %13 = arith.addf %7, %12 : vector<4x256xf32>
    %14 = vector.extract_strided_slice %0 {offsets = [0, 2], sizes = [4, 1], strides = [1, 1]} : vector<4x4xf32> to vector<4x1xf32>
    %15 = vector.extract_strided_slice %2 {offsets = [2, 0], sizes = [1, 256], strides = [1, 1]} : vector<4x256xf32> to vector<1x256xf32>
    %16 = vector.broadcast %14 : vector<4x1xf32> to vector<4x256xf32>
    %17 = vector.broadcast %15 : vector<1x256xf32> to vector<4x256xf32>
    %18 = arith.mulf %16, %17 : vector<4x256xf32>
    %19 = arith.addf %13, %18 : vector<4x256xf32>
    %20 = vector.extract_strided_slice %0 {offsets = [0, 3], sizes = [4, 1], strides = [1, 1]} : vector<4x4xf32> to vector<4x1xf32>
    %21 = vector.extract_strided_slice %2 {offsets = [3, 0], sizes = [1, 256], strides = [1, 1]} : vector<4x256xf32> to vector<1x256xf32>
    %22 = vector.broadcast %20 : vector<4x1xf32> to vector<4x256xf32>
    %23 = vector.broadcast %21 : vector<1x256xf32> to vector<4x256xf32>
    %24 = arith.mulf %22, %23 : vector<4x256xf32>
    %25 = arith.addf %19, %24 : vector<4x256xf32>
    %c0_4 = arith.constant 0 : index
    %c0_5 = arith.constant 0 : index
    %c0_6 = arith.constant 0 : index
    %26 = vector.load %arg5[%c0_4, %c0_5, %c0_6] : memref<1x4x256xf32, #tpu.memory_space<vmem>>, vector<1x4x256xf32>
    %27 = vector.shape_cast %26 : vector<1x4x256xf32> to vector<4x256xf32>
    %28 = vector.shape_cast %25 : vector<4x256xf32> to vector<1x4x256xf32>
    tpu.vector_store %arg5[%c0_4, %c0_5, %c0_6], %28 {strides = array<i32>} : memref<1x4x256xf32, #tpu.memory_space<vmem>>, vector<1x4x256xf32>,
    return
  }
  func.func @transform_0(%arg0: i32, %arg1: i32, %arg2: i32) -> (i32, i32, i32) {
    %c0_i32 = arith.constant 0 : i32
    %c0_i32_0 = arith.constant 0 : i32
    return %arg0, %c0_i32, %arg2 : i32, i32, i32
  }
  func.func @transform_1(%arg0: i32, %arg1: i32, %arg2: i32) -> (i32, i32) {
    %c0_i32 = arith.constant 0 : i32
    %c0_i32_0 = arith.constant 0 : i32
    return %arg1, %c0_i32 : i32, i32
  }
  func.func @transform_2(%arg0: i32, %arg1: i32, %arg2: i32) -> (i32, i32, i32) {
    %c0_i32 = arith.constant 0 : i32
    return %arg0, %arg1, %arg2 : i32, i32, i32
  }
}

</mosaic_0001>

<bundles_post_ra>
// kernel: tpu_custom_call.1
= control target key start
LH: loop header
LB: loop body
LE: loop exit
PB: predicated region body
PF: predicated region fallthrough
CT: control target
= control target key end

     0   :  { %7 = vsyncpa [#allocation3], 0  ;;  %s868_s0 = inlined_call_operand.hbm [shape: f32[2,4,256], index: 0, kind: input, shape index: {}]   ;;  %s869_s1 = inlined_call_operand.hbm [shape: f32[4,4], index: 1, kind: input, shape index: {}]   ;;  %s870_s2 = inlined_call_operand.hbm [shape: f32[2,4,256], index: 2, kind: output, shape index: {}]  }
   0x1   :  { %9 = vsyncpa [#allocation3 + $0x1], 0 }
   0x2   :  { %10 = vsyncpa [#allocation6], 0 }
   0x3   :  { %11 = vsyncpa [#allocation4], 0 }
   0x4   :  { %13 = vsyncpa [#allocation4 + $0x1], 0  ;;  %s703_s9 = smov 0   ;;  %s705_s10 = smov 0  }
   0x5   :  { %s707_s11 = smov 0   ;;  %s709_s12 = smov 0  }
   0x6   :  { %s711_s13 = smov 0   ;;  %s713_s14 = smov 0  }
   0x7 LB: > { %s440_s15 = sadd.s32 4294967295, %s679_s14   ;;  %s441_s16 = sadd.s32 4294967294, %s679_s14   ;;  %s679_s14 = sphi %s713_s14, %s19_s14   ;;  %s675_s13 = sphi %s711_s13, %s887_s13   ;;  %s671_s12 = sphi %s709_s12, %s886_s12   ;;  %s667_s11 = sphi %s707_s11, %s885_s11   ;;  %s663_s10 = sphi %s705_s10, %s884_s10   ;;  %s659_s9 = sphi %s703_s9, %s883_s9  }
   0x8   : > { %p60_p0 = scmp.ne.s32.totalorder %s663_s10, %s659_s9  ;;  %p737_p1 = scmp.eq.s32.totalorder %s440_s15, 0 }
   0x9   : > { %p741_p2 = scmp.eq.s32.totalorder %s440_s15, 1  ;;  %p120_p3 = scmp.eq.s32.totalorder %s441_s16, 1 }
   0xa   : > { %p747_p4 = por %p737_p1, %p60_p0  ;;  %p442_p5 = scmp.ge.s32.totalorder %s679_s14, 1 }
   0xb   : > { %p752_p6 = por %p120_p3, %p60_p0  ;;  %p127_p7 = scmp.lt.s32.totalorder %s679_s14, 3 }
   0xc   : > { %s874_s19 = scalar_select %p747_p4, 1, 0 }
   0xd   : > { %s875_s20 = scalar_select %p752_p6, 1, 0 }
   0xe   : > { %p757_p8 = pnand %p442_p5, %p127_p7  ;;  %s681_s22 = smov [#allocation5]  }
   0xf   : > { %s142_s23 = sshll.u32 %s681_s22, 4  ;;  %s38_s25 = sadd.s32 1, %s675_s13  ;;  %s143_s23 = int_to_ptr.vmem [resolvable:$true] %s142_s23 }
  0x10   : > { %p467_p10 = pneg %p757_p8  ;;  %s47_s26 = sadd.s32 1, %s667_s11 }
  0x11   : > { %p40_p12 = scmp.ge.s32.totalorder %s38_s25, 2  ;;  %s552_s27 = scalar_lea.vmem %s143_s23, 64 }
  0x12   : > { %p766_p11 = pnand %p467_p10, %p737_p1  ;;  %p553_p0 = scmp.ne.s32.totalorder %s143_s23, %s552_s27 }
  0x13   : > { %p560_p7 = scmp.lt.s32.totalorder %s143_s23, %s143_s23  ;;  %p561_p6 = scmp.lt.s32.totalorder %s552_s27, %s552_s27 }
  0x14   : > { %p543_p13 = pneg %p766_p11 }
  0x15   : > { %p562_p9 = por %p561_p6, %p560_p7 }
  0x16   : > { %p555_p3 = pnand %p553_p0, %p543_p13 }
  0x18   : > { %p556_p5 = pneg %p555_p3 }
  0x1a   : > { %p563_p4 = pnand %p562_p9, %p556_p5 }
  0x1c   : > { %566 = shalt.err (!%p563_p4)
}
  0x1d   : > { %470 = dma.hbm_to_vmem [thread:$0]  (!%p766_p11), %s869_s1, 64, %s143_s23, [#allocation6]  }
  0x1e   : > { %s889_s25 = smov (%p40_p12, %s38_s25), 0  ;;  %p54_p6 = scmp.ne.s32.totalorder %s667_s11, %s663_s10 }
  0x1f   : > { %p55_p4 = scmp.eq.s32.totalorder %s679_s14, 0  ;;  %s42_s30 = ssub.s32 %s675_s13, %s889_s25 }
  0x20   : > { %p480_p9 = scmp.lt.s32.totalorder %s679_s14, 2  ;;  %p45_p10 = scmp.eq.s32.totalorder %s42_s30, 0 }
  0x21   : > { %p56_p13 = por %p55_p4, %p54_p6  ;;  %p789_p0 = por %p741_p2, %p54_p6 }
  0x22   : > { %s153_s4 = sand.u32 1, %s667_s11   ;;  %s457_s7 = sshll.u32 %s675_s13, 7 }
  0x23   : > { %s795_s5 = scalar_select %p45_p10, %s667_s11, %s47_s26  }
  0x24   : > { %s445_s6 = sshll.u32 %s153_s4, 3  ;;  %s165_s16 = scalar_lea.hbm %s868_s0, %s457_s7 }
  0x25   : > { %s157_s22 = scalar_lea.vmem [#allocation2], %s445_s6  ;;  %p801_p11 = pnand %p480_p9, %p56_p13 }
  0x26   : > { %s167_s23 = sshll.u32 %s157_s22, 4  ;;  %s154_s18 = scalar_lea.sflag [#allocation3], %s153_s4  ;;  %s168_s23 = int_to_ptr.vmem [resolvable:$true] %s167_s23 }
  0x27   : > { %p569_p2 = pneg %p801_p11  ;;  %s580_s27 = scalar_lea.vmem %s168_s23, 128 }
  0x28   : > { %p581_p12 = scmp.ne.s32.totalorder %s168_s23, %s580_s27  ;;  %s682_s26 = smov [#allocation2]  }
  0x29   : > { %s585_s28 = sshll.u32 %s682_s26, 4  ;;  %s586_s28 = int_to_ptr.vmem [resolvable:$false] %s585_s28 }
  0x2a   : > { %p583_p3 = pnand %p581_p12, %p569_p2  ;;  %s587_s29 = scalar_lea.vmem %s586_s28, 256 }
  0x2b   : > { %p588_p7 = scmp.lt.s32.totalorder %s168_s23, %s586_s28  ;;  %p589_p6 = scmp.lt.s32.totalorder %s587_s29, %s580_s27 }
  0x2c   : > { %p584_p5 = pneg %p583_p3 }
  0x2d   : > { %p590_p4 = por %p589_p6, %p588_p7 }
  0x2f   : > { %p591_p10 = pnand %p590_p4, %p584_p5 }
  0x31   : > { %594 = shalt.err (!%p591_p10)
}
  0x32   : > { %474 = dma.hbm_to_vmem [thread:$0]  (!%p801_p11), %s165_s16, 128, %s168_s23, %s154_s18  }
  0x33   : > { %176 = sbr.rel (%p757_p8) target bundleno = 213 (0xd5), region = 28  ;;  %s812_s30 = sand.u32 (!%p757_p8), 1, %s663_s10  }
  0x34   : > { %s449_s4 = sshll.u32 (!%p757_p8), %s812_s30, 3  ;;  %s179_s6 = scalar_lea.sflag (!%p757_p8), [#allocation3], %s812_s30 }
  0x35   : > { %s182_s7 = scalar_lea.vmem (!%p757_p8), [#allocation2], %s449_s4  ;;  %p880_p9 = scmp.ne.s32.totalorder (!%p757_p8), %s874_s19, 0 }
  0x38   : > { %646 = dma.done.wait (%p880_p9), %s179_s6, 128  }
  0x39   : > { %648 = vsyncadd (%p880_p9), %s179_s6, 4294967168 }
  0x3a   : > { %650 = dma.done.wait (%p737_p1), [#allocation6], 64  }
  0x3b   : > { %652 = vsyncadd (%p737_p1), [#allocation6], 4294967232  ;;  %v683_v0 = vmov 0   ;;  %v684_v1 = vmov 2   ;;  %v209_v2 = vld [vmem:[#allocation5] sm:$0xf]  ;;  %v217_v5 = vlaneseq }
  0x3c   : > { %536 = vset.pattern.permute.xlu0 %v683_v0  ;;  %538 = vset.pattern.permute.xlu1 %v684_v1  ;;  %v685_v3 = vmov 1   ;;  %v686_v4 = vmov 3   ;;  %v210_v11 = vld [vmem:[%s182_s7] sm:$0xff]  ;;  %s458_s17 = sshll.u32 %s671_s12, 7  ;;  %s206_s19 = scalar_lea.vmem [#allocation7], %s449_s4 }
  0x3d   : > { %213 = vperm.xlu0 %536, %v209_v2   ;;  %264 = vperm.xlu1 %538, %v209_v2   ;;  %v218_v6 = vshrl.u32 %v217_v5, 7  ;;  %s339_s21 = sshll.u32 %s206_s19, 4  ;;  %s337_s16 = scalar_lea.hbm %s870_s2, %s458_s17  ;;  %s340_s21 = int_to_ptr.vmem [resolvable:$true] %s339_s21 }
  0x3e   : > { %s321_s22 = scalar_lea.sflag [#allocation4], %s812_s30  ;;  %s595_s23 = scalar_lea.vmem %s340_s21, 128 }
  0x3f   : > { %v219_v7 = vsub.s32 0, %v218_v6  ;;  %v223_v8 = vsub.s32 4, %v218_v6  ;;  %v243_v9 = vsub.s32 1, %v218_v6  ;;  %v247_v10 = vsub.s32 5, %v218_v6  ;;  %p596_p1 = scmp.ne.s32.totalorder %s340_s21, %s595_s23  ;;  %s687_s24 = smov [#allocation7]  }
  0x40   : > { %v269_v12 = vsub.s32 2, %v218_v6  ;;  %v273_v13 = vsub.s32 6, %v218_v6  ;;  %v295_v14 = vsub.s32 3, %v218_v6  ;;  %v299_v15 = vsub.s32 7, %v218_v6  ;;  %s599_s12 = sshll.u32 %s687_s24, 4  ;;  %s600_s12 = int_to_ptr.vmem [resolvable:$false] %s599_s12 }
  0x41   : > { %537 = vset.pattern.permute.xlu0 %v685_v3  ;;  %539 = vset.pattern.permute.xlu1 %v686_v4  ;;  %v220_v16 = vrot.slane %v210_v11, %v219_v7  ;;  %v224_v17 = vrot.slane %v210_v11, %v223_v8  ;;  %v244_v18 = vrot.slane %v210_v11, %v243_v9  ;;  %p597_p8 = pnand %p596_p1, %p789_p0  ;;  %s601_s18 = scalar_lea.vmem %s600_s12, 256 }
  0x42   : > { %238 = vperm.xlu0 %537, %v209_v2   ;;  %290 = vperm.xlu1 %539, %v209_v2   ;;  %v248_v19 = vrot.slane %v210_v11, %v247_v10  ;;  %v270_v20 = vrot.slane %v210_v11, %v269_v12  ;;  %v274_v21 = vrot.slane %v210_v11, %v273_v13  ;;  %p602_p11 = scmp.lt.s32.totalorder %s340_s21, %s600_s12  ;;  %p603_p2 = scmp.lt.s32.totalorder %s601_s18, %s595_s23 }
  0x43   : > { %v296_v24 = vrot.slane %v210_v11, %v295_v14  ;;  %v300_v25 = vrot.slane %v210_v11, %v299_v15  ;;  %v230_v26 = vrot.slane %v220_v16, %v219_v7  ;;  %v234_v27 = vrot.slane %v224_v17, %v219_v7  ;;  %p598_p13 = pneg %p597_p8 }
  0x44   : > { %v254_v28 = vrot.slane %v244_v18, %v243_v9  ;;  %v258_v29 = vrot.slane %v248_v19, %v243_v9  ;;  %v280_v30 = vrot.slane %v270_v20, %v269_v12  ;;  %v284_v31 = vrot.slane %v274_v21, %v269_v12  ;;  %p604_p12 = por %p603_p2, %p602_p11 }
  0x45   : > { %v306_v32 = vrot.slane %v296_v24, %v295_v14  ;;  %v310_v33 = vrot.slane %v300_v25, %v295_v14 }
  0x46   : > { %540 = vset.pattern.permute.xlu0 %v686_v4  ;;  %p605_p3 = pnand %p604_p12, %p598_p13 }
  0xb8   : > { %v214_v22 = vpop.permute.xlu0 %213  ;;  %v265_v23 = vpop.permute.xlu1 %264 }
  0xb9   : > { %v235_v36 = vmul.f32 %v230_v26, %v214_v22  ;;  %v236_v37 = vmul.f32 %v234_v27, %v214_v22  ;;  %v285_v40 = vmul.f32 %v280_v30, %v265_v23  ;;  %v286_v41 = vmul.f32 %v284_v31, %v265_v23 }
  0xbd   : > { %v239_v34 = vpop.permute.xlu0 %238  ;;  %v291_v35 = vpop.permute.xlu1 %290 }
  0xbe   : > { %v259_v38 = vmul.f32 %v254_v28, %v239_v34  ;;  %v260_v39 = vmul.f32 %v258_v29, %v239_v34  ;;  %v311_v44 = vmul.f32 %v306_v32, %v291_v35  ;;  %v312_v45 = vmul.f32 %v310_v33, %v291_v35 }
  0xc0   : > { %v261_v42 = vadd.f32 %v259_v38, %v235_v36  ;;  %v262_v43 = vadd.f32 %v260_v39, %v236_v37 }
  0xc2   : > { %v287_v46 = vadd.f32 %v285_v40, %v261_v42  ;;  %v288_v47 = vadd.f32 %v286_v41, %v262_v43 }
  0xc4   : > { %v313_v48 = vadd.f32 %v311_v44, %v287_v46  ;;  %v314_v49 = vadd.f32 %v312_v45, %v288_v47 }
  0xc6   : > { %v317_v50 = vcombine.low %v313_v48, %v314_v49 }
  0xc8   : > { %319 = vst [vmem:[%s206_s19] sm:$0xff] %v317_v50 }
  0xc9   : > { %608 = shalt.err (!%p605_p3)
}
  0xca   : > { %s609_s27 = scalar_lea.hbm %s337_s16, 128  ;;  %s613_s29 = scalar_lea.hbm %s870_s2, 256 }
  0xcb   : > { %p610_p5 = scmp.ne.s32.totalorder %s337_s16, %s609_s27  ;;  %p614_p4 = scmp.lt.s32.totalorder %s337_s16, %s870_s2 }
  0xcc   : > { %p615_p10 = scmp.lt.s32.totalorder %s613_s29, %s609_s27 }
  0xcd   : > { %p611_p7 = pnand %p610_p5, %p789_p0 }
  0xce   : > { %p616_p9 = por %p615_p10, %p614_p4 }
  0xcf   : > { %p612_p6 = pneg %p611_p7 }
  0xd1   : > { %p617_p1 = pnand %p616_p9, %p612_p6 }
  0xd3   : > { %620 = shalt.err (!%p617_p1)
}
  0xd4   : > { %465 = dma.vmem_to_hbm [thread:$0]  (%p789_p0), %s340_s21, 128, %s337_s16, %s321_s22  }
  0xd5 PF: > { %s351_s6 = sand.u32 1, %s659_s9   ;;  %p881_p8 = scmp.ne.s32.totalorder %s875_s20, 0 }
  0xd6   : > { %p882_p13 = scmp.ge.s32.totalorder %s679_s14, 2  ;;  %s352_s7 = scalar_lea.sflag [#allocation4], %s351_s6 }
  0xd8   : > { %p476_p11 = pnand %p882_p13, %p881_p8 }
  0xda   : > { %p477_p2 = pneg %p476_p11 }
  0xdc   : > { %654 = dma.done.wait (%p477_p2), %s352_s7, 128  }
  0xdd   : > { %656 = vsyncadd (%p477_p2), %s352_s7, 4294967168  ;;  %s19_s14 = sadd.s32 1, %s679_s14   ;;  %s883_s9 = smov %s663_s10 }
  0xde   : > { %p16_p12 = scmp.ge.s32.totalorder %s19_s14, 4   ;;  %s884_s10 = smov %s667_s11 }
  0xdf   : > { %s885_s11 = smov %s795_s5  ;;  %s886_s12 = smov %s675_s13 }
  0xe0   : > { %s887_s13 = smov %s889_s25  ;;  %18 = sbr.rel (!%p16_p12) target bundleno = 7 (0x7), region = 78 }
  0xe5   :  { %357 = vsyncpa [#allocation3], 1 }
  0xe6   :  { %359 = vsyncpa [#allocation3 + $0x1], 1 }
  0xe7   :  { %360 = vsyncpa [#allocation6], 1 }
  0xe8   :  { %361 = vsyncpa [#allocation4], 1 }
  0xe9   :  { %363 = vsyncpa [#allocation4 + $0x1], 1 }

</bundles_post_ra>
